<compile_context>
chip_gen: v5e
topology: v5e:2x2
jax: 0.10.0
libtpu: 0.0.40
codegen_flags: <defaults>
</compile_context>

<pallas_src>
import functools

import jax
import jax.numpy as jnp
from jax.experimental import pallas as pl
from jax.experimental.pallas import tpu as pltpu


# ----------------------------------------------------------------------------
# Small helpers: padding + VMEM-aware row-tile selection.
# ----------------------------------------------------------------------------
def _round_up(x, m):
    return ((x + m - 1) // m) * m


def _vmem_capacity_bytes():
    try:
        cap = int(pltpu.get_tpu_info().vmem_capacity_bytes)
        if cap > 0:
            return cap
    except Exception:
        pass
    return 64 * 1024 * 1024  # conservative fallback (v7x per-TC physical VMEM)


def _choose_row_tile(n_pad, f_in, f_out, out_bytes):
    """Largest TM (multiple of 128, divisor of n_pad, <= n_pad//2 so both v7x
    TensorCores get row tiles) whose total double-buffered VMEM footprint fits in
    half the physical VMEM (rest: compiler scratch + margin)."""
    budget = _vmem_capacity_bytes() // 2
    # TM-independent resident operands (counted double-buffered to be safe):
    #   XW (n_pad, f_out) bf16, Wr^T (f_in, f_out) bf16, bias f32.
    fixed = 2 * (n_pad * f_out * 2 + f_in * f_out * 2 + f_out * 4)
    # Per-output-row streamed bytes (double-buffered):
    #   A row (n_pad bf16) + xt row (f_in bf16) + output row (f_out out_bytes).
    per_row = 2 * (n_pad * 2 + f_in * 2 + f_out * out_bytes)
    tm_max = max((budget - fixed) // max(per_row, 1), 0)
    cap_rows = min(n_pad // 2, 2048)  # >= 2 grid steps -> megacore on v7x
    best = 0
    d = 128
    while d <= cap_rows:
        if n_pad % d == 0 and d <= tm_max:
            best = d
        d += 128
    if best == 0:
        best = 128  # minimum lane/MXU-aligned tile; huge graphs want the sparse path
    return best


# ----------------------------------------------------------------------------
# Pallas kernel: one fused SAGEConv layer row tile
#   out = act( A_tile @ XW + X_tile @ Wr^T + b [+ X_tile] )
# ----------------------------------------------------------------------------
def _sage_layer_kernel(a_ref, xw_ref, xt_ref, wr_ref, b_ref, o_ref, *,
                       activation, residual, softplus_split):
    # a_ref : (TM, Npad)   bf16  row tile of normalized weighted adjacency (streamed)
    # xw_ref: (Npad, Fout) bf16  hoisted neighbor pre-projection X @ Wl^T (resident)
    # xt_ref: (TM, Fin)    bf16  this tile's own features (self term / residual)
    # wr_ref: (Fin, Fout)  bf16  W_r^T (resident)
    # b_ref : (1, Fout)    f32   bias (resident)
    h = jnp.dot(a_ref[...], xw_ref[...], preferred_element_type=jnp.float32)
    h = h + jnp.dot(xt_ref[...], wr_ref[...], preferred_element_type=jnp.float32)
    h = h + b_ref[...]
    if residual:
        h = h + xt_ref[...].astype(jnp.float32)
    if activation == "relu":
        h = jnp.maximum(h, 0.0)
    if softplus_split is not None:
        # fused mu/logvar heads: stable softplus only on the logvar columns.
        col = jax.lax.broadcasted_iota(jnp.int32, h.shape, 1)
        h = jnp.where(col < softplus_split, h, jnp.logaddexp(h, 0.0))
    o_ref[...] = h.astype(o_ref.dtype)


def sage_layer(adj, x, w_l_t, w_r_t, bias, *, activation="none", residual=False,
               softplus_split=None, out_dtype=jnp.float32, tile_rows=None):
    n_pad = adj.shape[0]
    f_in = x.shape[1]
    f_out = w_l_t.shape[1]
    out_bytes = jnp.dtype(out_dtype).itemsize
    tm = tile_rows if tile_rows is not None else _choose_row_tile(
        n_pad, f_in, f_out, out_bytes)
    assert n_pad % tm == 0 and tm % 128 == 0
    grid = (n_pad // tm,)

    # bf16 operands, cast ONCE per layer (not per grid step).
    xb = x.astype(jnp.bfloat16)
    wl = w_l_t.astype(jnp.bfloat16)
    wr = w_r_t.astype(jnp.bfloat16)
    # Hoisted neighbor pre-projection, computed once per layer (bf16 MXU, f32 acc).
    xw = jnp.dot(xb, wl, preferred_element_type=jnp.float32).astype(jnp.bfloat16)

    kernel = functools.partial(_sage_layer_kernel, activation=activation,
                               residual=residual, softplus_split=softplus_split)
    vmem_limit = int(_vmem_capacity_bytes() * 3 // 4)

    return pl.pallas_call(
        kernel,
        out_shape=jax.ShapeDtypeStruct((n_pad, f_out), out_dtype),
        grid=grid,
        in_specs=[
            pl.BlockSpec((tm, n_pad), lambda i: (i, 0)),     # A: row-tiled, dbl-buffered
            pl.BlockSpec((n_pad, f_out), lambda i: (0, 0)),  # XW: resident
            pl.BlockSpec((tm, f_in), lambda i: (i, 0)),      # X row tile (self/residual)
            pl.BlockSpec((f_in, f_out), lambda i: (0, 0)),   # Wr^T: resident
            pl.BlockSpec((1, f_out), lambda i: (0, 0)),      # bias: resident
        ],
        out_specs=pl.BlockSpec((tm, f_out), lambda i: (i, 0)),
        compiler_params=pltpu.CompilerParams(
            dimension_semantics=("parallel",),   # shard row tiles across v7x's 2 TCs
            vmem_limit_bytes=vmem_limit),
    )(adj, xw, xb, wr, bias.reshape(1, f_out).astype(jnp.float32))


# ----------------------------------------------------------------------------
# Plain-JAX glue: dense, edge-weighted, mean-normalized adjacency.
# Accumulated in f32 (duplicate edges, 1/deg) and cast to bf16 once at the end.
# ----------------------------------------------------------------------------
def build_mean_adjacency(edge_index, edge_attr, num_nodes, num_nodes_padded):
    src = edge_index[0]  # message source j
    dst = edge_index[1]  # message target i
    w = edge_attr.astype(jnp.float32).reshape(-1)
    deg = jnp.zeros((num_nodes,), jnp.float32).at[dst].add(1.0)
    w_norm = w / jnp.maximum(deg[dst], 1.0)
    adj = jnp.zeros((num_nodes_padded, num_nodes_padded), jnp.float32)
    adj = adj.at[dst, src].add(w_norm)
    return adj.astype(jnp.bfloat16)


# ----------------------------------------------------------------------------
# Parameter construction (deterministic, Glorot-uniform-ish like PyG defaults).
# ----------------------------------------------------------------------------
def init_sageconv(key, in_ch, out_ch):
    k_l, k_r = jax.random.split(key)
    lim = (6.0 / (in_ch + out_ch)) ** 0.5
    w_l = jax.random.uniform(k_l, (out_ch, in_ch), jnp.float32, -lim, lim)
    w_r = jax.random.uniform(k_r, (out_ch, in_ch), jnp.float32, -lim, lim)
    b_l = jnp.zeros((out_ch,), jnp.float32)
    # stored transposed (Fin, Fout) for the kernel's row-major matmul layout
    return dict(w_l_t=w_l.T, w_r_t=w_r.T, b=b_l)


def init_graphsage_encoder(key, in_channels, hidden_channels, num_layers, out_channels):
    if num_layers < 1:
        raise ValueError("num_layers must be >= 1")
    keys = jax.random.split(key, num_layers + 1 if num_layers > 1 else 2)
    convs = []
    if num_layers == 1:
        convs.append(init_sageconv(keys[0], in_channels, out_channels))
        convs.append(init_sageconv(keys[1], in_channels, out_channels))
    else:
        convs.append(init_sageconv(keys[0], in_channels, hidden_channels))
        for l in range(num_layers - 2):
            convs.append(init_sageconv(keys[1 + l], hidden_channels, hidden_channels))
        convs.append(init_sageconv(keys[num_layers - 1], hidden_channels, out_channels))
        convs.append(init_sageconv(keys[num_layers], hidden_channels, out_channels))
    return convs


# ----------------------------------------------------------------------------
# Forward pass mirroring GraphSAGEncoder.forward
# ----------------------------------------------------------------------------
def graphsage_encoder_forward(convs, x, edge_index, edge_attr):
    n, f_in = x.shape
    n_pad = _round_up(n, 256)   # lane-dense / MXU-aligned, independent of the row tile

    adj = build_mean_adjacency(edge_index, edge_attr, n, n_pad)

    # padded node features (padded nodes have no edges, so their columns in A are zero
    # and they never contribute to real rows)
    h = jnp.zeros((n_pad, f_in), jnp.bfloat16).at[:n].set(x.astype(jnp.bfloat16))

    n_convs = len(convs)
    # Hidden stack: mirrors the torch loop exactly, including the `break` right after
    # i == len(convs) - 3 (for the degenerate num_layers==1 / 2-conv case the break
    # never fires and both convs run with relu, as in the torch code).
    for i in range(n_convs):
        p = convs[i]
        h = sage_layer(adj, h, p["w_l_t"], p["w_r_t"], p["b"],
                       activation="relu", residual=(i != 0),
                       out_dtype=jnp.bfloat16)
        if i == n_convs - 3:
            break

    # Fused mu / logvar heads: adjacency is streamed from HBM only once for both.
    p_mu, p_lv = convs[-2], convs[-1]
    f_out = p_mu["w_l_t"].shape[1]
    wl = jnp.concatenate([p_mu["w_l_t"], p_lv["w_l_t"]], axis=1)
    wr = jnp.concatenate([p_mu["w_r_t"], p_lv["w_r_t"]], axis=1)
    b = jnp.concatenate([p_mu["b"], p_lv["b"]], axis=0)
    heads = sage_layer(adj, h, wl, wr, b, activation="none", residual=False,
                       softplus_split=f_out, out_dtype=jnp.float32)
    mu = heads[:n, :f_out]
    logvar = heads[:n, f_out:]
    return mu, logvar


# ----------------------------------------------------------------------------
if __name__ == "__main__":
    key = jax.random.PRNGKey(0)
    k_x, k_ei, k_ea, k_params = jax.random.split(key, 4)

    # small synthetic graph
    N = 128            # nodes
    E = 256            # edges
    IN_CH = 16
    HIDDEN = 32
    OUT_CH = 8
    NUM_LAYERS = 3

    x = jax.random.normal(k_x, (N, IN_CH), jnp.float32)
    edge_index = jax.random.randint(k_ei, (2, E), 0, N, jnp.int32)
    edge_attr = jax.random.uniform(k_ea, (E,), jnp.float32)

    convs = init_graphsage_encoder(k_params, IN_CH, HIDDEN, NUM_LAYERS, OUT_CH)

    mu, logvar = graphsage_encoder_forward(convs, x, edge_index, edge_attr)
    jax.block_until_ready((mu, logvar))

    assert mu.shape == (N, OUT_CH) and logvar.shape == (N, OUT_CH)
    assert bool(jnp.all(logvar >= 0.0))  # softplus output is non-negative
    print("KERNEL_OK")
</pallas_src>

<mosaic_0001>
module attributes {stable_mosaic.version = 11 : i64} {
  func.func @_sage_layer_kernel(%arg0: i32, %arg1: memref<128x256xbf16, #tpu.memory_space<vmem>>, %arg2: memref<256x32xbf16, #tpu.memory_space<vmem>>, %arg3: memref<128x16xbf16, #tpu.memory_space<vmem>>, %arg4: memref<16x32xbf16, #tpu.memory_space<vmem>>, %arg5: memref<1x32xf32, #tpu.memory_space<vmem>>, %arg6: memref<128x32xbf16, #tpu.memory_space<vmem>>) attributes {dimension_semantics = [#tpu.dimension_semantics<parallel>], iteration_bounds = array<i64: 2>, scalar_prefetch = 0 : i64, scratch_operands = 0 : i64, tpu.core_type = #tpu.core_type<tc>, window_params = [{transform_indices = @transform_0, window_bounds = array<i64: 128, 256>}, {pipeline_mode = #tpu.pipeline_mode<synchronous>, transform_indices = @transform_1, window_bounds = array<i64: 256, 32>}, {transform_indices = @transform_2, window_bounds = array<i64: 128, 16>}, {pipeline_mode = #tpu.pipeline_mode<synchronous>, transform_indices = @transform_3, window_bounds = array<i64: 16, 32>}, {pipeline_mode = #tpu.pipeline_mode<synchronous>, transform_indices = @transform_4, window_bounds = array<i64: 1, 32>}, {transform_indices = @transform_5, window_bounds = array<i64: 128, 32>}]} {
    %c0 = arith.constant 0 : index
    %c0_0 = arith.constant 0 : index
    %0 = vector.load %arg1[%c0, %c0_0] : memref<128x256xbf16, #tpu.memory_space<vmem>>, vector<128x256xbf16>
    %c0_1 = arith.constant 0 : index
    %c0_2 = arith.constant 0 : index
    %1 = vector.load %arg2[%c0_1, %c0_2] : memref<256x32xbf16, #tpu.memory_space<vmem>>, vector<256x32xbf16>
    %cst = arith.constant dense<0.000000e+00> : vector<128x32xf32>
    %2 = tpu.matmul %0, %1, %cst {dimension_numbers = #tpu.dot_dimension_numbers<[1], [0], [0], [1], [0, 0, 1, 1], [], []>} : vector<128x256xbf16>, vector<256x32xbf16>, vector<128x32xf32> -> vector<128x32xf32>
    %c0_3 = arith.constant 0 : index
    %c0_4 = arith.constant 0 : index
    %3 = vector.load %arg3[%c0_3, %c0_4] : memref<128x16xbf16, #tpu.memory_space<vmem>>, vector<128x16xbf16>
    %c0_5 = arith.constant 0 : index
    %c0_6 = arith.constant 0 : index
    %4 = vector.load %arg4[%c0_5, %c0_6] : memref<16x32xbf16, #tpu.memory_space<vmem>>, vector<16x32xbf16>
    %cst_7 = arith.constant dense<0.000000e+00> : vector<128x32xf32>
    %5 = tpu.matmul %3, %4, %cst_7 {dimension_numbers = #tpu.dot_dimension_numbers<[1], [0], [0], [1], [0, 0, 1, 1], [], []>} : vector<128x16xbf16>, vector<16x32xbf16>, vector<128x32xf32> -> vector<128x32xf32>
    %6 = arith.addf %2, %5 : vector<128x32xf32>
    %c0_8 = arith.constant 0 : index
    %c0_9 = arith.constant 0 : index
    %7 = vector.load %arg5[%c0_8, %c0_9] : memref<1x32xf32, #tpu.memory_space<vmem>>, vector<1x32xf32>
    %8 = vector.broadcast %7 : vector<1x32xf32> to vector<128x32xf32>
    %9 = arith.addf %6, %8 : vector<128x32xf32>
    %cst_10 = arith.constant 0.000000e+00 : f32
    %10 = vector.broadcast %cst_10 : f32 to vector<128x32xf32>
    %11 = arith.maximumf %9, %10 : vector<128x32xf32>
    %12 = arith.truncf %11 : vector<128x32xf32> to vector<128x32xbf16>
    %c0_11 = arith.constant 0 : index
    %c0_12 = arith.constant 0 : index
    %13 = vector.load %arg6[%c0_11, %c0_12] : memref<128x32xbf16, #tpu.memory_space<vmem>>, vector<128x32xbf16>
    tpu.vector_store %arg6[%c0_11, %c0_12], %12 {strides = array<i32>} : memref<128x32xbf16, #tpu.memory_space<vmem>>, vector<128x32xbf16>,
    return
  }
  func.func @transform_0(%arg0: i32) -> (i32, i32) {
    %c0_i32 = arith.constant 0 : i32
    %c0_i32_0 = arith.constant 0 : i32
    return %arg0, %c0_i32 : i32, i32
  }
  func.func @transform_1(%arg0: i32) -> (i32, i32) {
    %c0_i32 = arith.constant 0 : i32
    %c0_i32_0 = arith.constant 0 : i32
    %c0_i32_1 = arith.constant 0 : i32
    return %c0_i32, %c0_i32_0 : i32, i32
  }
  func.func @transform_2(%arg0: i32) -> (i32, i32) {
    %c0_i32 = arith.constant 0 : i32
    %c0_i32_0 = arith.constant 0 : i32
    return %arg0, %c0_i32 : i32, i32
  }
  func.func @transform_3(%arg0: i32) -> (i32, i32) {
    %c0_i32 = arith.constant 0 : i32
    %c0_i32_0 = arith.constant 0 : i32
    %c0_i32_1 = arith.constant 0 : i32
    return %c0_i32, %c0_i32_0 : i32, i32
  }
  func.func @transform_4(%arg0: i32) -> (i32, i32) {
    %c0_i32 = arith.constant 0 : i32
    %c0_i32_0 = arith.constant 0 : i32
    %c0_i32_1 = arith.constant 0 : i32
    return %c0_i32, %c0_i32_0 : i32, i32
  }
  func.func @transform_5(%arg0: i32) -> (i32, i32) {
    %c0_i32 = arith.constant 0 : i32
    %c0_i32_0 = arith.constant 0 : i32
    return %arg0, %c0_i32 : i32, i32
  }
}

</mosaic_0001>

<bundles_post_ra>
// kernel: tpu_custom_call.1
= control target key start
LH: loop header
LB: loop body
LE: loop exit
PB: predicated region body
PF: predicated region fallthrough
CT: control target
= control target key end

     0   :  { %s1142_s18 = smov 0   ;;  %s1334_s0 = inlined_call_operand.vmem [shape: bf16[256,256], index: 0, kind: input, shape index: {}]   ;;  %s1335_s1 = inlined_call_operand.vmem [shape: bf16[256,32], index: 1, kind: input, shape index: {}]   ;;  %s1336_s2 = inlined_call_operand.vmem [shape: bf16[256,16], index: 2, kind: input, shape index: {}]   ;;  %s1337_s3 = inlined_call_operand.vmem [shape: bf16[16,32], index: 3, kind: input, shape index: {}]   ;;  %s1338_s4 = inlined_call_operand.vmem [shape: f32[1,32], index: 4, kind: input, shape index: {}]   ;;  %s1339_s5 = inlined_call_operand.vmem [shape: bf16[256,32], index: 5, kind: output, shape index: {}]  }
   0x1 LB: > { %s851_s19 = sadd.s32 4294967295, %s1110_s18   ;;  %p855_p0 = scmp.ge.s32.totalorder %s1110_s18, 1  ;;  %s1110_s18 = sphi %s1142_s18, %s15_s18  }
   0x2   : > { %p200_p1 = scmp.lt.s32.totalorder %s1110_s18, 3 }
   0x4   : > { %p201_p2 = pnand %p855_p0, %p200_p1 }
   0x5   : > { %s856_s26 = sshll.u32 (!%p201_p2), %s851_s19, 4 }
   0x6   : > { %204 = sbr.rel (%p201_p2) target bundleno = 273 (0x111), region = 40  ;;  %p235_p3 = scmp.lt.s32.totalorder (!%p201_p2), %s856_s26, 31 }
   0xb   : > { %v1061_v0 = vld [vmem:[%s1335_s1 + $0x38] sm:$0xff]  ;;  %v1078_v2 = vld [vmem:[%s1337_s3] sm:$0xff]  ;;  %v1060_v3 = vld [vmem:[%s1335_s1 + $0x30] sm:$0xff]  ;;  %s1341_s26 = smov (!%p235_p3, %s856_s26), 31  ;;  %vm366_vm0 = vcmask 130048   ;;  %vm766_vm1 = vcmask 257024  }
   0xc   : > { %v1069_v1 = vld [vmem:[%s1335_s1 + $0x78] sm:$0xff]  ;;  %616 = vmatpush.bf16.msra.mxu1 %v1061_v0  ;;  %v1068_v4 = vld [vmem:[%s1335_s1 + $0x70] sm:$0xff]  ;;  %398 = vmatpush.bf16.msra.mxu0 %v1078_v2  ;;  %s860_s6 = sshll.u32 %s1341_s26, 2  ;;  %v1059_v5 = vld [vmem:[%s1335_s1 + $0x28] sm:$0xff]  ;;  %s1037_s28 = sshll.u32 %s1341_s26, 3 }
   0xd   : > { %665 = vmatpush.bf16.msra.mxu2 %v1069_v1  ;;  %1079 = vmatpush.bf16.msra.mxu3 %v1061_v0  ;;  %s1173_s9 = scalar_lea.vmem %s1336_s2, %s860_s6  ;;  %v1067_v6 = vld [vmem:[%s1335_s1 + $0x68] sm:$0xff]  ;;  %v1058_v8 = vld [vmem:[%s1335_s1 + $0x20] sm:$0xff]  ;;  %v1057_v10 = vld [vmem:[%s1335_s1 + $0x18] sm:$0xff]  ;;  %s1206_s7 = scalar_lea.vmem %s1334_s0, %s1037_s28 }
   0xe   : > { %v1070_v7 = vld [vmem:[%s1173_s9] sm:$0xff]  ;;  %v1065_v11 = vld [vmem:[%s1335_s1 + $0x58] sm:$0xff]  ;;  %v1056_v12 = vld [vmem:[%s1335_s1 + $0x10] sm:$0xff]  ;;  %s1276_s21 = scalar_lea.vmem %s1339_s5, %s860_s6 }
   0xf   : > { %899 = vmatmul.msk.bf16.vlgmr.msra.gmra.mxu0 %vm366_vm0, %v1070_v7  ;;  %v1066_v9 = vld [vmem:[%s1335_s1 + $0x60] sm:$0xff]  ;;  %v1064_v13 = vld [vmem:[%s1335_s1 + $0x50] sm:$0xff]  ;;  %v1071_v14 = vld [vmem:[%s1173_s9 + $0x8] sm:$0xff] }
  0x10   : > { %617 = vmatpush.bf16.msra.mxu1 %v1060_v3  ;;  %v1055_v15 = vld [vmem:[%s1335_s1 + $0x8] sm:$0xff]  ;;  %v1054_v17 = vld [vmem:[%s1335_s1] sm:$0xff]  ;;  %v1072_v28 = vld [vmem:[%s1173_s9 + $0x10] sm:$0xff] }
  0x11   : > { %666 = vmatpush.bf16.msra.mxu2 %v1068_v4  ;;  %1080 = vmatpush.bf16.msra.mxu3 %v1060_v3  ;;  %v1063_v16 = vld [vmem:[%s1335_s1 + $0x48] sm:$0xff]  ;;  %v1062_v18 = vld [vmem:[%s1335_s1 + $0x40] sm:$0xff]  ;;  %v917_v29 = vld [vmem:[%s1206_s7 + $0x10] sm:$0xf] }
  0x12   : > { %v909_v19 = vld [vmem:[%s1206_s7] sm:$0xf]  ;;  %v1039_v20 = vld [vmem:[%s1206_s7 + $0x4] sm:$0xf0]  ;;  %v1038_v21 = vld [vmem:[%s1206_s7 + $0x4] sm:$0xf] }
  0x13   : > { %v911_v22 = vld [vmem:[%s1206_s7 + $0x8] sm:$0xf0]  ;;  %v957_v23 = vld [vmem:[%s1206_s7 + $0x60] sm:$0xf]  ;;  %v1051_v24 = vld [vmem:[%s1206_s7 + $0x64] sm:$0xf0]  ;;  %v910_v25 = vor.u32 %v1039_v20, %v909_v19 }
  0x14   : > { %618 = vmatpush.bf16.msra.mxu1 %v1059_v5  ;;  %v914_v26 = vor.u32 %v1038_v21, %v911_v22  ;;  %v958_v27 = vor.u32 %v1051_v24, %v957_v23  ;;  %v1041_v30 = vld [vmem:[%s1206_s7 + $0x14] sm:$0xf0]  ;;  %v1040_v31 = vld [vmem:[%s1206_s7 + $0x14] sm:$0xf]  ;;  %v919_v32 = vld [vmem:[%s1206_s7 + $0x18] sm:$0xf0] }
  0x15   : > { %667 = vmatpush.bf16.msra.mxu2 %v1067_v6  ;;  %1081 = vmatpush.bf16.msra.mxu3 %v1059_v5  ;;  %v965_v33 = vld [vmem:[%s1206_s7 + $0x70] sm:$0xf]  ;;  %v1053_v34 = vld [vmem:[%s1206_s7 + $0x74] sm:$0xf0]  ;;  %v918_v35 = vor.u32 %v1041_v30, %v917_v29  ;;  %v922_v36 = vor.u32 %v1040_v31, %v919_v32  ;;  %v925_v39 = vld [vmem:[%s1206_s7 + $0x20] sm:$0xf] }
  0x16   : > { %v966_v37 = vor.u32 %v1053_v34, %v965_v33  ;;  %v1073_v38 = vld [vmem:[%s1173_s9 + $0x18] sm:$0xff]  ;;  %v1043_v40 = vld [vmem:[%s1206_s7 + $0x24] sm:$0xf0]  ;;  %v1042_v41 = vld [vmem:[%s1206_s7 + $0x24] sm:$0xf] }
  0x17   : > { %v927_v42 = vld [vmem:[%s1206_s7 + $0x28] sm:$0xf0]  ;;  %v1050_v43 = vld [vmem:[%s1206_s7 + $0x64] sm:$0xf]  ;;  %v926_v45 = vor.u32 %v1043_v40, %v925_v39  ;;  %v933_v49 = vld [vmem:[%s1206_s7 + $0x30] sm:$0xf] }
  0x18   : > { %619 = vmatpush.bf16.msra.mxu1 %v1058_v8  ;;  %v959_v44 = vld [vmem:[%s1206_s7 + $0x68] sm:$0xf0]  ;;  %v930_v46 = vor.u32 %v1042_v41, %v927_v42  ;;  %v1074_v48 = vld [vmem:[%s1173_s9 + $0x20] sm:$0xff]  ;;  %v1045_v50 = vld [vmem:[%s1206_s7 + $0x34] sm:$0xf0] }
  0x19   : > { %668 = vmatpush.bf16.msra.mxu2 %v1066_v9  ;;  %1082 = vmatpush.bf16.msra.mxu3 %v1058_v8  ;;  %v962_v47 = vor.u32 %v1050_v43, %v959_v44  ;;  %v1044_v51 = vld [vmem:[%s1206_s7 + $0x34] sm:$0xf]  ;;  %v935_v52 = vld [vmem:[%s1206_s7 + $0x38] sm:$0xf0]  ;;  %v934_v55 = vor.u32 %v1045_v50, %v933_v49  ;;  %v1075_v58 = vld [vmem:[%s1173_s9 + $0x28] sm:$0xff] }
  0x1a   : > { %v1052_v53 = vld [vmem:[%s1206_s7 + $0x74] sm:$0xf]  ;;  %v967_v54 = vld [vmem:[%s1206_s7 + $0x78] sm:$0xf0]  ;;  %v938_v56 = vor.u32 %v1044_v51, %v935_v52  ;;  %v941_v59 = vld [vmem:[%s1206_s7 + $0x40] sm:$0xf] }
  0x1b   : > { %v970_v57 = vor.u32 %v1052_v53, %v967_v54  ;;  %v1047_v60 = vld [vmem:[%s1206_s7 + $0x44] sm:$0xf0]  ;;  %v1046_v61 = vld [vmem:[%s1206_s7 + $0x44] sm:$0xf]  ;;  %v943_v62 = vld [vmem:[%s1206_s7 + $0x48] sm:$0xf0] }
  0x1c   : > { %620 = vmatpush.bf16.msra.mxu1 %v1057_v10  ;;  %v942_v63 = vor.u32 %v1047_v60, %v941_v59  ;;  %v946_v0 = vor.u32 %v1046_v61, %v943_v62  ;;  %v949_v2 = vld [vmem:[%s1206_s7 + $0x50] sm:$0xf]  ;;  %v1049_v3 = vld [vmem:[%s1206_s7 + $0x54] sm:$0xf0]  ;;  %v951_v5 = vld [vmem:[%s1206_s7 + $0x58] sm:$0xf0] }
  0x1d   : > { %669 = vmatpush.bf16.msra.mxu2 %v1065_v11  ;;  %1083 = vmatpush.bf16.msra.mxu3 %v1057_v10  ;;  %v1077_v8 = vld [vmem:[%s1173_s9 + $0x38] sm:$0xff] }
  0x1f   : > { %900 = vmatmul.msk.bf16.gmra.mxu0 %vm366_vm0, %v1071_v14 }
  0x20   : > { %621 = vmatpush.bf16.msra.mxu1 %v1056_v12 }
  0x21   : > { %670 = vmatpush.bf16.msra.mxu2 %v1064_v13  ;;  %1084 = vmatpush.bf16.msra.mxu3 %v1056_v12 }
  0x24   : > { %622 = vmatpush.bf16.msra.mxu1 %v1055_v15 }
  0x25   : > { %671 = vmatpush.bf16.msra.mxu2 %v1063_v16  ;;  %1085 = vmatpush.bf16.msra.mxu3 %v1055_v15  ;;  %v1268_v15 = vld [vmem:[%s1338_s4] ss:$0 sm:$0xff] }
  0x28   : > { %623 = vmatpush.bf16.msra.mxu1 %v1054_v17 }
  0x29   : > { %672 = vmatpush.bf16.msra.mxu2 %v1062_v18  ;;  %1086 = vmatpush.bf16.msra.mxu3 %v1054_v17 }
  0x2b   : > { %624 = vmatmul.bf16.vlgmr.msra.gmra.mxu1 %v910_v25 }
  0x2c   : > { %673 = vmatmul.bf16.vlgmr.msra.gmra.mxu2 %v914_v26  ;;  %654 = vmatmul.bf16.vlgmr.msra.gmra.mxu3 %v958_v27 }
  0x2d   : > { %1087 = vmatpush.bf16.msrb.mxu3 %v1069_v1  ;;  %v1076_v1 = vld [vmem:[%s1173_s9 + $0x30] sm:$0xff] }
  0x2f   : > { %901 = vmatmul.msk.bf16.gmra.mxu0 %vm366_vm0, %v1072_v28 }
  0x31   : > { %1088 = vmatpush.bf16.msrb.mxu3 %v1068_v4  ;;  %v1048_v4 = vld [vmem:[%s1206_s7 + $0x54] sm:$0xf] }
  0x32   : > { %v954_v7 = vor.u32 %v1048_v4, %v951_v5 }
  0x35   : > { %1089 = vmatpush.bf16.msrb.mxu3 %v1067_v6  ;;  %v950_v6 = vor.u32 %v1049_v3, %v949_v2 }
  0x39   : > { %1090 = vmatpush.bf16.msrb.mxu3 %v1066_v9 }
  0x3b   : > { %629 = vmatmul.bf16.gmra.mxu1 %v918_v35 }
  0x3c   : > { %678 = vmatmul.bf16.gmra.mxu2 %v922_v36  ;;  %659 = vmatmul.bf16.gmra.mxu3 %v966_v37 }
  0x3d   : > { %1091 = vmatpush.bf16.msrb.mxu3 %v1065_v11 }
  0x3f   : > { %902 = vmatmul.msk.bf16.gmra.mxu0 %vm366_vm0, %v1073_v38 }
  0x41   : > { %1092 = vmatpush.bf16.msrb.mxu3 %v1064_v13 }
  0x45   : > { %1093 = vmatpush.bf16.msrb.mxu3 %v1063_v16 }
  0x49   : > { %1094 = vmatpush.bf16.msrb.mxu3 %v1062_v18 }
  0x4b   : > { %634 = vmatmul.bf16.gmra.mxu1 %v926_v45 }
  0x4c   : > { %683 = vmatmul.bf16.gmra.mxu2 %v930_v46  ;;  %703 = vmatmul.bf16.vlgmr.msrb.gmra.mxu3 %v962_v47 }
  0x4f   : > { %903 = vmatmul.msk.bf16.gmra.mxu0 %vm366_vm0, %v1074_v48 }
  0x5b   : > { %639 = vmatmul.bf16.gmra.mxu1 %v934_v55 }
  0x5c   : > { %688 = vmatmul.bf16.gmra.mxu2 %v938_v56  ;;  %708 = vmatmul.bf16.gmra.mxu3 %v970_v57 }
  0x5f   : > { %904 = vmatmul.msk.bf16.gmra.mxu0 %vm366_vm0, %v1075_v58 }
  0x6b   : > { %644 = vmatmul.bf16.gmra.mxu1 %v942_v63 }
  0x6c   : > { %693 = vmatmul.bf16.gmra.mxu2 %v946_v0 }
  0x6f   : > { %905 = vmatmul.msk.bf16.gmra.mxu0 %vm366_vm0, %v1076_v1 }
  0x7b   : > { %649 = vmatmul.bf16.gmra.mxu1 %v950_v6 }
  0x7c   : > { %698 = vmatmul.bf16.gmra.mxu2 %v954_v7 }
  0x7f   : > { %906 = vmatmul.msk.bf16.gmra.mxu0 %vm366_vm0, %v1077_v8 }
  0x8c   : > { %v400_v9 = vpop.f32.mrf.mxu0 }
  0x94   : > { %v402_v10 = vpop.f32.mrf.mxu0 }
  0x9c   : > { %v405_v11 = vpop.f32.mrf.mxu0 }
  0xa4   : > { %v407_v12 = vpop.f32.mrf.mxu0 }
  0xa8   : > { %v625_v13 = vpop.f32.mrf.mxu1 }
  0xa9   : > { %v626_v14 = vadd.f32 %v625_v13, %v400_v9 }
  0xac   : > { %v410_v18 = vpop.f32.mrf.mxu0 }
  0xaf   : > { %v674_v16 = vpop.f32.mrf.mxu2  ;;  %v655_v38 = vpop.f32.mrf.mxu3 }
  0xb0   : > { %v675_v17 = vadd.f32 %v674_v16, %v626_v14  ;;  %v627_v19 = vpop.f32.mrf.mxu1 }
  0xb1   : > { %v628_v23 = vadd.f32 %v627_v19, %v402_v10 }
  0xb2   : > { %v718_v20 = vadd.f32 %v1268_v15, %v675_v17 }
  0xb4   : > { %v734_v21 = vmax.f32 %v718_v20, 0.0  ;;  %v412_v26 = vpop.f32.mrf.mxu0 }
  0xb6   : > { %v750_v22 = vpack.c.bf16 %v734_v21, %v734_v21 }
  0xb7   : > { %v676_v24 = vpop.f32.mrf.mxu2  ;;  %v657_v49 = vpop.f32.mrf.mxu3 }
  0xb8   : > { %767 = vst.msk [vmem:[%s1276_s21] sm:$0xf] %vm766_vm1, %v750_v22  ;;  %v677_v25 = vadd.f32 %v676_v24, %v628_v23  ;;  %v630_v27 = vpop.f32.mrf.mxu1 }
  0xb9   : > { %v631_v31 = vadd.f32 %v630_v27, %v405_v11 }
  0xba   : > { %v719_v28 = vadd.f32 %v1268_v15, %v677_v25 }
  0xbc   : > { %v735_v29 = vmax.f32 %v719_v28, 0.0  ;;  %v415_v34 = vpop.f32.mrf.mxu0 }
  0xbe   : > { %v751_v30 = vpack.c.bf16 %v735_v29, %v735_v29 }
  0xbf   : > { %v679_v32 = vpop.f32.mrf.mxu2  ;;  %v1292_v60 = vpop.f32.mrf.mxu3 }
  0xc0   : > { %768 = vst.msk [vmem:[%s1276_s21 + $0x4] sm:$0xf] %vm766_vm1, %v751_v30  ;;  %v680_v33 = vadd.f32 %v679_v32, %v631_v31  ;;  %v632_v35 = vpop.f32.mrf.mxu1 }
  0xc1   : > { %v633_v40 = vadd.f32 %v632_v35, %v407_v12 }
  0xc2   : > { %v720_v36 = vadd.f32 %v1268_v15, %v680_v33 }
  0xc4   : > { %v736_v37 = vmax.f32 %v720_v36, 0.0  ;;  %v417_v43 = vpop.f32.mrf.mxu0 }
  0xc6   : > { %v752_v39 = vpack.c.bf16 %v736_v37, %v736_v37 }
  0xc7   : > { %v681_v41 = vpop.f32.mrf.mxu2  ;;  %v1298_v8 = vpop.f32.mrf.mxu3 }
  0xc8   : > { %769 = vst.msk [vmem:[%s1276_s21 + $0x8] sm:$0xf] %vm766_vm1, %v752_v39  ;;  %v682_v42 = vadd.f32 %v681_v41, %v633_v40  ;;  %v635_v44 = vpop.f32.mrf.mxu1 }
  0xc9   : > { %v636_v48 = vadd.f32 %v635_v44, %v410_v18 }
  0xca   : > { %v721_v45 = vadd.f32 %v1268_v15, %v682_v42 }
  0xcc   : > { %v737_v46 = vmax.f32 %v721_v45, 0.0  ;;  %v420_v52 = vpop.f32.mrf.mxu0 }
  0xce   : > { %v753_v47 = vpack.c.bf16 %v737_v46, %v737_v46 }
  0xcf   : > { %v684_v50 = vpop.f32.mrf.mxu2  ;;  %v704_v19 = vpop.f32.mrf.mxu3 }
  0xd0   : > { %770 = vst.msk [vmem:[%s1276_s21 + $0xc] sm:$0xf] %vm766_vm1, %v753_v47  ;;  %v685_v51 = vadd.f32 %v684_v50, %v636_v48  ;;  %v637_v53 = vpop.f32.mrf.mxu1 }
  0xd1   : > { %v638_v57 = vadd.f32 %v637_v53, %v412_v26 }
  0xd2   : > { %v722_v54 = vadd.f32 %v1268_v15, %v685_v51 }
  0xd4   : > { %v738_v55 = vmax.f32 %v722_v54, 0.0  ;;  %v422_v61 = vpop.f32.mrf.mxu0 }
  0xd6   : > { %v754_v56 = vpack.c.bf16 %v738_v55, %v738_v55 }
  0xd7   : > { %v686_v58 = vpop.f32.mrf.mxu2  ;;  %v706_v33 = vpop.f32.mrf.mxu3 }
  0xd8   : > { %771 = vst.msk [vmem:[%s1276_s21 + $0x10] sm:$0xf] %vm766_vm1, %v754_v56  ;;  %v687_v59 = vadd.f32 %v686_v58, %v638_v57  ;;  %v640_v62 = vpop.f32.mrf.mxu1 }
  0xd9   : > { %v641_v2 = vadd.f32 %v640_v62, %v415_v34 }
  0xda   : > { %v723_v63 = vadd.f32 %v1268_v15, %v687_v59 }
  0xdc   : > { %v739_v0 = vmax.f32 %v723_v63, 0.0  ;;  %v425_v5 = vpop.f32.mrf.mxu0 }
  0xde   : > { %v755_v1 = vpack.c.bf16 %v739_v0, %v739_v0 }
  0xdf   : > { %v689_v3 = vpop.f32.mrf.mxu2  ;;  %v709_v51 = vpop.f32.mrf.mxu3 }
  0xe0   : > { %772 = vst.msk [vmem:[%s1276_s21 + $0x14] sm:$0xf] %vm766_vm1, %v755_v1  ;;  %v690_v4 = vadd.f32 %v689_v3, %v641_v2  ;;  %v642_v6 = vpop.f32.mrf.mxu1 }
  0xe1   : > { %v643_v11 = vadd.f32 %v642_v6, %v417_v43 }
  0xe2   : > { %v724_v7 = vadd.f32 %v1268_v15, %v690_v4 }
  0xe4   : > { %v740_v9 = vmax.f32 %v724_v7, 0.0  ;;  %v427_v14 = vpop.f32.mrf.mxu0 }
  0xe6   : > { %v756_v10 = vpack.c.bf16 %v740_v9, %v740_v9 }
  0xe7   : > { %v691_v12 = vpop.f32.mrf.mxu2  ;;  %v711_v4 = vpop.f32.mrf.mxu3 }
  0xe8   : > { %773 = vst.msk [vmem:[%s1276_s21 + $0x18] sm:$0xf] %vm766_vm1, %v756_v10  ;;  %v692_v13 = vadd.f32 %v691_v12, %v643_v11  ;;  %v645_v16 = vpop.f32.mrf.mxu1 }
  0xe9   : > { %v646_v21 = vadd.f32 %v645_v16, %v420_v52 }
  0xea   : > { %v725_v17 = vadd.f32 %v1268_v15, %v692_v13 }
  0xec   : > { %v741_v18 = vmax.f32 %v725_v17, 0.0  ;;  %v430_v24 = vpop.f32.mrf.mxu0 }
  0xed   : > { %v656_v27 = vadd.f32 %v655_v38, %v430_v24 }
  0xee   : > { %v757_v20 = vpack.c.bf16 %v741_v18, %v741_v18 }
  0xef   : > { %v694_v22 = vpop.f32.mrf.mxu2  ;;  %v705_v29 = vadd.f32 %v704_v19, %v656_v27 }
  0xf0   : > { %774 = vst.msk [vmem:[%s1276_s21 + $0x1c] sm:$0xf] %vm766_vm1, %v757_v20  ;;  %v695_v23 = vadd.f32 %v694_v22, %v646_v21  ;;  %v647_v25 = vpop.f32.mrf.mxu1 }
  0xf1   : > { %v730_v31 = vadd.f32 %v1268_v15, %v705_v29  ;;  %v648_v32 = vadd.f32 %v647_v25, %v422_v61 }
  0xf2   : > { %v726_v26 = vadd.f32 %v1268_v15, %v695_v23 }
  0xf3   : > { %v746_v35 = vmax.f32 %v730_v31, 0.0 }
  0xf4   : > { %v742_v28 = vmax.f32 %v726_v26, 0.0  ;;  %v432_v37 = vpop.f32.mrf.mxu0 }
  0xf5   : > { %v762_v40 = vpack.c.bf16 %v746_v35, %v746_v35  ;;  %v658_v38 = vadd.f32 %v657_v49, %v432_v37 }
  0xf6   : > { %v758_v30 = vpack.c.bf16 %v742_v28, %v742_v28 }
  0xf7   : > { %v696_v34 = vpop.f32.mrf.mxu2  ;;  %779 = vst.msk [vmem:[%s1276_s21 + $0x30] sm:$0xf] %vm766_vm1, %v762_v40  ;;  %v707_v43 = vadd.f32 %v706_v33, %v658_v38 }
  0xf8   : > { %775 = vst.msk [vmem:[%s1276_s21 + $0x20] sm:$0xf] %vm766_vm1, %v758_v30  ;;  %v697_v36 = vadd.f32 %v696_v34, %v648_v32  ;;  %v650_v39 = vpop.f32.mrf.mxu1 }
  0xf9   : > { %v731_v45 = vadd.f32 %v1268_v15, %v707_v43  ;;  %v651_v46 = vadd.f32 %v650_v39, %v425_v5 }
  0xfa   : > { %v727_v41 = vadd.f32 %v1268_v15, %v697_v36 }
  0xfb   : > { %v747_v48 = vmax.f32 %v731_v45, 0.0 }
  0xfc   : > { %v743_v42 = vmax.f32 %v727_v41, 0.0  ;;  %v435_v52 = vpop.f32.mrf.mxu0 }
  0xfd   : > { %v763_v53 = vpack.c.bf16 %v747_v48, %v747_v48  ;;  %v661_v54 = vadd.f32 %v1292_v60, %v435_v52 }
  0xfe   : > { %v759_v44 = vpack.c.bf16 %v743_v42, %v743_v42 }
  0xff   : > { %v699_v47 = vpop.f32.mrf.mxu2  ;;  %780 = vst.msk [vmem:[%s1276_s21 + $0x34] sm:$0xf] %vm766_vm1, %v763_v53  ;;  %v710_v57 = vadd.f32 %v709_v51, %v661_v54 }
 0x100   : > { %776 = vst.msk [vmem:[%s1276_s21 + $0x24] sm:$0xf] %vm766_vm1, %v759_v44  ;;  %v700_v50 = vadd.f32 %v699_v47, %v651_v46  ;;  %v652_v55 = vpop.f32.mrf.mxu1 }
 0x101   : > { %v732_v59 = vadd.f32 %v1268_v15, %v710_v57  ;;  %v653_v61 = vadd.f32 %v652_v55, %v427_v14 }
 0x102   : > { %v728_v49 = vadd.f32 %v1268_v15, %v700_v50 }
 0x103   : > { %v748_v63 = vmax.f32 %v732_v59, 0.0 }
 0x104   : > { %v744_v56 = vmax.f32 %v728_v49, 0.0  ;;  %v437_v1 = vpop.f32.mrf.mxu0 }
 0x105   : > { %v764_v2 = vpack.c.bf16 %v748_v63, %v748_v63  ;;  %v663_v3 = vadd.f32 %v1298_v8, %v437_v1 }
 0x106   : > { %v760_v58 = vpack.c.bf16 %v744_v56, %v744_v56 }
 0x107   : > { %v701_v62 = vpop.f32.mrf.mxu2  ;;  %781 = vst.msk [vmem:[%s1276_s21 + $0x38] sm:$0xf] %vm766_vm1, %v764_v2  ;;  %v712_v6 = vadd.f32 %v711_v4, %v663_v3 }
 0x108   : > { %777 = vst.msk [vmem:[%s1276_s21 + $0x28] sm:$0xf] %vm766_vm1, %v760_v58  ;;  %v702_v0 = vadd.f32 %v701_v62, %v653_v61 }
 0x109   : > { %v733_v9 = vadd.f32 %v1268_v15, %v712_v6 }
 0x10a   : > { %v729_v60 = vadd.f32 %v1268_v15, %v702_v0 }
 0x10b   : > { %v749_v10 = vmax.f32 %v733_v9, 0.0 }
 0x10c   : > { %v745_v5 = vmax.f32 %v729_v60, 0.0 }
 0x10d   : > { %v765_v11 = vpack.c.bf16 %v749_v10, %v749_v10 }
 0x10e   : > { %v761_v7 = vpack.c.bf16 %v745_v5, %v745_v5 }
 0x10f   : > { %782 = vst.msk [vmem:[%s1276_s21 + $0x3c] sm:$0xf] %vm766_vm1, %v765_v11 }
 0x110   : > { %778 = vst.msk [vmem:[%s1276_s21 + $0x2c] sm:$0xf] %vm766_vm1, %v761_v7 }
 0x111 PF: > { %s15_s18 = sadd.s32 1, %s1110_s18  }
 0x112   : > { %p12_p4 = scmp.ge.s32.totalorder %s15_s18, 4  }
 0x114   :  { %14 = sbr.rel (!%p12_p4) target bundleno = 1 (0x1), region = 73 }

</bundles_post_ra>
